<compile_context>
chip_gen: v7x
topology: tpu7x:2x2x1
jax: 0.10.0
libtpu: 0.0.40
codegen_flags: <defaults>
</compile_context>

<pallas_src>
import jax
import jax.numpy as jnp
from jax.experimental import pallas as pl
from jax.experimental.pallas import tpu as pltpu

_MB = 1024 * 1024


def _round_up(x, m):
    return ((x + m - 1) // m) * m


def _tpu_hw():
    """Per-generation tiling / VMEM parameters (safe fallback if unknown)."""
    try:
        kind = jax.devices()[0].device_kind.lower()
    except Exception:
        kind = ""
    if "v7" in kind:
        # 64 MiB physical VMEM, 2 TensorCores/chip, 2x256x256 MXU.
        return dict(vmem_limit=48 * _MB, tm_cap=512, gran=256, two_tc=True)
    if "v6" in kind:
        # 128 MiB physical VMEM, 2x256x256 MXU, highest flops:BW ratio.
        return dict(vmem_limit=64 * _MB, tm_cap=512, gran=256, two_tc=False)
    if "v5" in kind:
        # 128 MiB physical VMEM (16 MiB scoped default), 128x128 MXU tiles.
        return dict(vmem_limit=64 * _MB, tm_cap=256, gran=128, two_tc=False)
    # Unknown / older chip: conservative defaults.
    return dict(vmem_limit=32 * _MB, tm_cap=256, gran=128, two_tc=False)


def _pick_tile(dim, cap, gran):
    """Largest sensible tile: covers `dim` if it fits under `cap`, else `cap`."""
    if dim <= cap:
        return _round_up(dim, gran)
    return cap  # cap is a multiple of gran by construction


def select_kn_tiles(K, N, hw):
    gran_k = hw["gran"] if K >= hw["gran"] else 128
    gran_n = hw["gran"] if N >= hw["gran"] else 128
    tk = _pick_tile(K, 2048, gran_k)   # keep d_model in one K tile when possible
    tn = _pick_tile(N, 1024, gran_n)   # big, lane-dense weight / output tiles
    return tk, tn


# ----------------------------- Pallas kernels ------------------------------

def _matmul_kernel_single_k(x_ref, w_ref, o_ref):
    """K fits one tile: direct MXU matmul, no accumulator, no phases."""
    o_ref[...] = jnp.dot(
        x_ref[...], w_ref[...], preferred_element_type=jnp.float32
    ).astype(o_ref.dtype)


def _matmul_kernel_acc_inplace(x_ref, w_ref, o_ref):
    """Multi K-step matmul accumulating directly into the resident f32 output."""
    @pl.when(pl.program_id(2) == 0)
    def _():
        o_ref[...] = jnp.zeros_like(o_ref)

    o_ref[...] += jnp.dot(
        x_ref[...], w_ref[...], preferred_element_type=jnp.float32
    )


# ------------------------------ matmul wrapper ------------------------------

def projection_matmul(x, w_padded, *, K, N, tk, tn, hw):
    """x: [M, K] (any float dtype) @ pre-padded bf16 weight [Kp, Np] -> f32 [M, N].

    bf16 MXU inputs, f32 accumulation.  Weight is already cast/padded (cached
    at module init) so the only per-call data movement is the activation.
    """
    M = x.shape[0]
    assert x.shape[1] == K
    Kp, Np = w_padded.shape

    # ---- M tile: per-generation cap; keep multiples of 16 (bf16 sublane pack).
    tm = min(hw["tm_cap"], _round_up(M, 16))

    # VMEM budget safeguard (double-buffered bf16 inputs + f32 output tile).
    def vmem_bytes(tm_, tk_, tn_):
        return 2 * (tm_ * tk_ + tk_ * tn_) * 2 + 2 * tm_ * tn_ * 4

    while vmem_bytes(tm, tk, tn) > int(0.8 * hw["vmem_limit"]) and tm > 16:
        tm = max(16, _round_up(tm // 2, 16))

    Mp = _round_up(M, tm)
    gm, gn, gk = Mp // tm, Np // tn, Kp // tk

    # v7x megacore: make sure the parallel axes have product >= 2 when the
    # grid would otherwise collapse to a single block and tn can be halved
    # while staying >= 256 (and still dividing Np).
    if hw["two_tc"] and gm == 1 and gn == 1 and tn >= 512 and tn % 2 == 0:
        tn = tn // 2
        gn = Np // tn

    # ---- Pad / cast the activation only (weight is pre-padded & cached). ----
    xb = x.astype(jnp.bfloat16)
    if (Mp, Kp) != (M, K):
        xb = jnp.pad(xb, ((0, Mp - M), (0, Kp - K)))

    # Advisory cost: count weight / activation re-streams across the grid.
    cost = pl.CostEstimate(
        flops=2 * Mp * Np * Kp,
        transcendentals=0,
        bytes_accessed=gm * Kp * Np * 2 + gn * Mp * Kp * 2 + Mp * Np * 4,
    )
    cparams = dict(vmem_limit_bytes=hw["vmem_limit"])

    if gk == 1:
        # Whole K in one tile: no accumulator, no predicated init/finalize.
        out = pl.pallas_call(
            _matmul_kernel_single_k,
            out_shape=jax.ShapeDtypeStruct((Mp, Np), jnp.float32),
            grid_spec=pltpu.PrefetchScalarGridSpec(
                num_scalar_prefetch=0,
                grid=(gm, gn),
                in_specs=[
                    pl.BlockSpec((tm, tk), lambda i, j: (i, 0)),
                    pl.BlockSpec((tk, tn), lambda i, j: (0, j)),
                ],
                out_specs=pl.BlockSpec((tm, tn), lambda i, j: (i, j)),
            ),
            compiler_params=pltpu.CompilerParams(
                dimension_semantics=("parallel", "parallel"), **cparams
            ),
            cost_estimate=cost,
        )(xb, w_padded)
    else:
        # Reduction axis innermost; accumulate in the resident f32 output block.
        out = pl.pallas_call(
            _matmul_kernel_acc_inplace,
            out_shape=jax.ShapeDtypeStruct((Mp, Np), jnp.float32),
            grid_spec=pltpu.PrefetchScalarGridSpec(
                num_scalar_prefetch=0,
                grid=(gm, gn, gk),
                in_specs=[
                    pl.BlockSpec((tm, tk), lambda i, j, k: (i, k)),
                    pl.BlockSpec((tk, tn), lambda i, j, k: (k, j)),
                ],
                out_specs=pl.BlockSpec((tm, tn), lambda i, j, k: (i, j)),
            ),
            compiler_params=pltpu.CompilerParams(
                dimension_semantics=("parallel", "parallel", "arbitrary"),
                **cparams,
            ),
            cost_estimate=cost,
        )(xb, w_padded)

    if (Mp, Np) != (M, N):
        out = out[:M, :N]
    return out


# --------------------------- Module equivalent -----------------------------

class TransformerPallas:
    """JAX/Pallas equivalent of the PyTorch `Transformer` module."""

    def __init__(self, d_model, tgt_vocab_size, key):
        self.d_model = d_model
        self.tgt_vocab_size = tgt_vocab_size
        self.hw = _tpu_hw()

        # nn.Linear(d_model, tgt_vocab_size, bias=False): weight is
        # [tgt_vocab_size, d_model]; store pre-transposed so the kernel
        # output is lane-dense along the vocab axis.
        bound = 1.0 / (d_model ** 0.5)
        w = jax.random.uniform(
            key, (tgt_vocab_size, d_model), jnp.float32, -bound, bound
        )
        self.w_t = jnp.transpose(w)  # [d_model, tgt_vocab_size] (f32, reference)

        # Cache the bf16, pre-padded weight once (the per-call cast/pad was an
        # extra full HBM round-trip of the weight every forward).
        self.tk, self.tn = select_kn_tiles(d_model, tgt_vocab_size, self.hw)
        Kp = _round_up(d_model, self.tk)
        Np = _round_up(tgt_vocab_size, self.tn)
        wb = self.w_t.astype(jnp.bfloat16)
        if (Kp, Np) != (d_model, tgt_vocab_size):
            wb = jnp.pad(wb, ((0, Kp - d_model), (0, Np - tgt_vocab_size)))
        self.w_padded = wb  # [Kp, Np] bf16, device-resident

    def __call__(self, enc_inputs, dec_inputs):
        # TODO(synk): Encoder / Decoder in the reference are empty nn.Modules with
        # no forward; there is no computation to translate, so the decoder output
        # is treated as an already-embedded [B, T, d_model] tensor.
        dec_outputs = dec_inputs

        B, T, D = dec_outputs.shape
        assert D == self.d_model
        x2d = dec_outputs.reshape(B * T, D)

        logits2d = projection_matmul(
            x2d, self.w_padded,
            K=self.d_model, N=self.tgt_vocab_size,
            tk=self.tk, tn=self.tn, hw=self.hw,
        )
        dec_logits = logits2d.reshape(B, T, self.tgt_vocab_size)
        # Note: the reference forward has no `return` statement (returns None);
        # we return the computed logits so the result can be inspected.
        return dec_logits


# --------------------------------- main ------------------------------------

if __name__ == "__main__":
    key = jax.random.PRNGKey(0)
    k_w, k_enc, k_dec = jax.random.split(key, 3)

    batch = 2
    src_len = 8
    tgt_len = 8
    d_model = 128
    tgt_vocab_size = 256

    model = TransformerPallas(d_model, tgt_vocab_size, k_w)

    # enc_inputs: [batch, src_len] token ids (unused by the stub Encoder).
    enc_inputs = jax.random.randint(k_enc, (batch, src_len), 0, tgt_vocab_size)
    # dec_inputs: embedded decoder states [batch, tgt_len, d_model].
    dec_inputs = jax.random.normal(k_dec, (batch, tgt_len, d_model), jnp.float32)

    dec_logits = model(enc_inputs, dec_inputs)
    dec_logits = jax.block_until_ready(dec_logits)

    assert dec_logits.shape == (batch, tgt_len, tgt_vocab_size)

    # Correctness check: the kernel feeds bf16 inputs to the MXU with f32
    # accumulation, so compare against a bf16-input / f32-accumulate reference.
    ref_bf16 = jnp.dot(
        dec_inputs.reshape(-1, d_model).astype(jnp.bfloat16),
        model.w_t.astype(jnp.bfloat16),
        preferred_element_type=jnp.float32,
    ).reshape(batch, tgt_len, tgt_vocab_size)
    assert jnp.allclose(dec_logits, ref_bf16, atol=1e-2, rtol=1e-2)

    # Loose sanity check against the full-f32 reference (bf16 quantization noise).
    ref_f32 = (dec_inputs.reshape(-1, d_model) @ model.w_t).reshape(
        batch, tgt_len, tgt_vocab_size
    )
    assert jnp.allclose(dec_logits, ref_f32, atol=5e-2, rtol=5e-2)

    print("KERNEL_OK")
</pallas_src>

<mosaic_0001>
module attributes {stable_mosaic.version = 11 : i64} {
  func.func @_matmul_kernel_single_k(%arg0: i32, %arg1: i32, %arg2: memref<16x128xbf16, #tpu.memory_space<vmem>>, %arg3: memref<128x256xbf16, #tpu.memory_space<vmem>>, %arg4: memref<16x256xf32, #tpu.memory_space<vmem>>) attributes {dimension_semantics = [#tpu.dimension_semantics<parallel>, #tpu.dimension_semantics<parallel>], iteration_bounds = array<i64: 1, 1>, scalar_prefetch = 0 : i64, scratch_operands = 0 : i64, tpu.core_type = #tpu.core_type<tc>, window_params = [{transform_indices = @transform_0, window_bounds = array<i64: 16, 128>}, {transform_indices = @transform_1, window_bounds = array<i64: 128, 256>}, {transform_indices = @transform_2, window_bounds = array<i64: 16, 256>}]} {
    %c0 = arith.constant 0 : index
    %c0_0 = arith.constant 0 : index
    %0 = vector.load %arg2[%c0, %c0_0] : memref<16x128xbf16, #tpu.memory_space<vmem>>, vector<16x128xbf16>
    %c0_1 = arith.constant 0 : index
    %c0_2 = arith.constant 0 : index
    %1 = vector.load %arg3[%c0_1, %c0_2] : memref<128x256xbf16, #tpu.memory_space<vmem>>, vector<128x256xbf16>
    %cst = arith.constant dense<0.000000e+00> : vector<16x256xf32>
    %2 = tpu.matmul %0, %1, %cst {dimension_numbers = #tpu.dot_dimension_numbers<[1], [0], [0], [1], [0, 0, 1, 1], [], []>} : vector<16x128xbf16>, vector<128x256xbf16>, vector<16x256xf32> -> vector<16x256xf32>
    %c0_3 = arith.constant 0 : index
    %c0_4 = arith.constant 0 : index
    %3 = vector.load %arg4[%c0_3, %c0_4] : memref<16x256xf32, #tpu.memory_space<vmem>>, vector<16x256xf32>
    tpu.vector_store %arg4[%c0_3, %c0_4], %2 {strides = array<i32>} : memref<16x256xf32, #tpu.memory_space<vmem>>, vector<16x256xf32>,
    return
  }
  func.func @transform_0(%arg0: i32, %arg1: i32) -> (i32, i32) {
    %c0_i32 = arith.constant 0 : i32
    %c0_i32_0 = arith.constant 0 : i32
    return %arg0, %c0_i32 : i32, i32
  }
  func.func @transform_1(%arg0: i32, %arg1: i32) -> (i32, i32) {
    %c0_i32 = arith.constant 0 : i32
    %c0_i32_0 = arith.constant 0 : i32
    return %c0_i32, %arg1 : i32, i32
  }
  func.func @transform_2(%arg0: i32, %arg1: i32) -> (i32, i32) {
    %c0_i32 = arith.constant 0 : i32
    return %arg0, %arg1 : i32, i32
  }
}

</mosaic_0001>

<bundles_post_ra>
// kernel: tpu_custom_call.1
= control target key start
LH: loop header
LB: loop body
LE: loop exit
PB: predicated region body
PF: predicated region fallthrough
CT: control target
= control target key end

     0   :  { %7 = vsyncpa [#allocation3], 0  ;;  %s395_s0 = inlined_call_operand.hbm [shape: bf16[16,128], index: 0, kind: input, shape index: {}]   ;;  %s396_s1 = inlined_call_operand.hbm [shape: bf16[128,256], index: 1, kind: input, shape index: {}]   ;;  %s397_s2 = inlined_call_operand.hbm [shape: f32[16,256], index: 2, kind: output, shape index: {}]  }
   0x1   :  { %8 = vsyncpa [#allocation6], 0 }
   0x2   :  { %9 = vsyncpa [#allocation4], 0  ;;  %s334_s9 = smov [#allocation2]   ;;  %s262_s13 = scalar_lea.hbm %s395_s0, 128 }
   0x3   :  { %s15_s10 = sshll.u32 %s334_s9, 4  ;;  %p263_p0 = scmp.ne.s32.totalorder %s395_s0, %s262_s13  ;;  %s16_s10 = int_to_ptr.vmem [resolvable:$true] %s15_s10 }
   0x4   :  { %p266_p1 = scmp.lt.u32.totalorder %s262_s13, %s395_s0 }
   0x6   :  { %p268_p2 = pnand %p266_p1, %p263_p0 }
   0x8   :  { %271 = shalt.err (!%p268_p2)
}
   0x9   :  { %s272_s18 = scalar_lea.vmem %s16_s10, 128  ;;  %p277_p4 = scmp.lt.s32.totalorder %s16_s10, %s16_s10 }
   0xa   :  { %p273_p3 = scmp.ne.s32.totalorder %s16_s10, %s272_s18  ;;  %p278_p5 = scmp.lt.s32.totalorder %s272_s18, %s272_s18 }
   0xc   :  { %p279_p6 = por %p278_p5, %p277_p4 }
   0xe   :  { %p280_p7 = pnand %p279_p6, %p273_p3 }
  0x10   :  { %283 = shalt.err (!%p280_p7)
}
  0x11   :  { %s335_s19 = smov 64   ;;  %s336_s20 = smov 4  }
  0x12   :  { %21 = dma.hbm_to_vmem [thread:$0]  %s395_s0, 128, %s16_s10, [#allocation3], %s335_s19, %s335_s19, %s336_s20  }
  0x13   :  { %s337_s23 = smov [#allocation5]   ;;  %s284_s27 = scalar_lea.hbm %s396_s1, 2048 }
  0x14   :  { %s27_s24 = sshll.u32 %s337_s23, 4  ;;  %p285_p8 = scmp.ne.s32.totalorder %s396_s1, %s284_s27  ;;  %s28_s24 = int_to_ptr.vmem [resolvable:$true] %s27_s24 }
  0x15   :  { %p288_p9 = scmp.lt.u32.totalorder %s284_s27, %s396_s1 }
  0x17   :  { %p290_p10 = pnand %p288_p9, %p285_p8 }
  0x19   :  { %293 = shalt.err (!%p290_p10)
}
  0x1a   :  { %s294_s4 = scalar_lea.vmem %s28_s24, 2048  ;;  %p299_p12 = scmp.lt.s32.totalorder %s28_s24, %s28_s24 }
  0x1b   :  { %p295_p11 = scmp.ne.s32.totalorder %s28_s24, %s294_s4  ;;  %p300_p13 = scmp.lt.s32.totalorder %s294_s4, %s294_s4 }
  0x1d   :  { %p301_p0 = por %p300_p13, %p299_p12 }
  0x1f   :  { %p302_p1 = pnand %p301_p0, %p295_p11 }
  0x21   :  { %305 = shalt.err (!%p302_p1)
}
  0x22   :  { %s338_s0 = smov 128   ;;  %s339_s5 = smov 8  }
  0x23   :  { %33 = dma.hbm_to_vmem [thread:$0]  %s396_s1, 2048, %s28_s24, [#allocation6], %s338_s0, %s338_s0, %s339_s5  }
  0x24   :  { %328 = dma.done.wait [#allocation3], 128  }
  0x25   :  { %329 = vsyncadd [#allocation3], 4294967168 }
  0x26   :  { %330 = dma.done.wait [#allocation6], 2048  }
  0x27   :  { %331 = vsyncadd [#allocation6], 4294965248  ;;  %v340_v0 = vmov 0   ;;  %v237_v1 = vld [vmem:[#allocation5 + $0x4] ss:$8 sps:$4 sm:$0xff]   ;;  %v261_v17 = vld [vmem:[#allocation2] sm:$0xff]  }
  0x28   :  { %177 = vmatprep.mubr.bf16.mxu0 %v340_v0  ;;  %v239_v2 = vld [vmem:[#allocation5] ss:$8 sps:$4 sm:$0xff]   ;;  %145 = vmatprep.subr.bf16.mxu0 %v237_v1  ;;  %v240_v3 = vld [vmem:[#allocation5 + $0x14] ss:$8 sps:$4 sm:$0xff]   ;;  %v242_v4 = vld [vmem:[#allocation5 + $0x10] ss:$8 sps:$4 sm:$0xff]  }
  0x29   :  { %146 = vmatpush1.bf16.msra.mxu0 %v239_v2  ;;  %v243_v5 = vld [vmem:[#allocation5 + $0x24] ss:$8 sps:$4 sm:$0xff]   ;;  %v245_v6 = vld [vmem:[#allocation5 + $0x20] ss:$8 sps:$4 sm:$0xff]   ;;  %v246_v7 = vld [vmem:[#allocation5 + $0x34] ss:$8 sps:$4 sm:$0xff]  }
  0x2a   :  { %147 = vmatprep.subr.bf16.mxu0 %v240_v3  ;;  %v248_v8 = vld [vmem:[#allocation5 + $0x30] ss:$8 sps:$4 sm:$0xff]   ;;  %v249_v9 = vld [vmem:[#allocation5 + $0x44] ss:$8 sps:$4 sm:$0xff]   ;;  %v251_v10 = vld [vmem:[#allocation5 + $0x40] ss:$8 sps:$4 sm:$0xff]  }
  0x2b   :  { %v252_v11 = vld [vmem:[#allocation5 + $0x54] ss:$8 sps:$4 sm:$0xff]   ;;  %v254_v12 = vld [vmem:[#allocation5 + $0x50] ss:$8 sps:$4 sm:$0xff]   ;;  %v255_v13 = vld [vmem:[#allocation5 + $0x64] ss:$8 sps:$4 sm:$0xff]  }
  0x2c   :  { %v257_v14 = vld [vmem:[#allocation5 + $0x60] ss:$8 sps:$4 sm:$0xff]   ;;  %v258_v15 = vld [vmem:[#allocation5 + $0x74] ss:$8 sps:$4 sm:$0xff]   ;;  %v260_v16 = vld [vmem:[#allocation5 + $0x70] ss:$8 sps:$4 sm:$0xff]  }
  0x2d   :  { %148 = vmatpush1.bf16.msra.mxu0 %v242_v4  ;;  %s341_s1 = smov [#allocation7]  }
  0x2e   :  { %149 = vmatprep.subr.bf16.mxu0 %v243_v5  ;;  %s197_s8 = sshll.u32 %s341_s1, 4  ;;  %s198_s8 = int_to_ptr.vmem [resolvable:$true] %s197_s8 }
  0x2f   :  { %s306_s9 = scalar_lea.vmem %s198_s8, 512  ;;  %p311_p3 = scmp.lt.s32.totalorder %s198_s8, %s198_s8 }
  0x30   :  { %p307_p2 = scmp.ne.s32.totalorder %s198_s8, %s306_s9  ;;  %p312_p4 = scmp.lt.s32.totalorder %s306_s9, %s306_s9 }
  0x31   :  { %150 = vmatpush1.bf16.msra.mxu0 %v245_v6 }
  0x32   :  { %151 = vmatprep.subr.bf16.mxu0 %v246_v7  ;;  %p313_p5 = por %p312_p4, %p311_p3 }
  0x34   :  { %p314_p6 = pnand %p313_p5, %p307_p2 }
  0x35   :  { %152 = vmatpush1.bf16.msra.mxu0 %v248_v8 }
  0x36   :  { %153 = vmatprep.subr.bf16.mxu0 %v249_v9 }
  0x39   :  { %154 = vmatpush1.bf16.msra.mxu0 %v251_v10 }
  0x3a   :  { %155 = vmatprep.subr.bf16.mxu0 %v252_v11 }
  0x3d   :  { %156 = vmatpush1.bf16.msra.mxu0 %v254_v12 }
  0x3e   :  { %157 = vmatprep.subr.bf16.mxu0 %v255_v13 }
  0x41   :  { %158 = vmatpush1.bf16.msra.mxu0 %v257_v14 }
  0x42   :  { %159 = vmatprep.subr.bf16.mxu0 %v258_v15 }
  0x45   :  { %160 = vmatpush1.bf16.msra.mxu0 %v260_v16 }
  0x48   :  { %178 = vmatmul.mubr.bf16.vlgmr.msra.gmra.mrb[0].mxu0 %v261_v17 }
 0x11b   :  { %v179_v18 = vpop.f32.mrb[0].mxu0 }
 0x11c   :  { %188 = vst [vmem:[#allocation7] sm:$0xff] %v179_v18  ;;  %v181_v19 = vpop.f32.mrb[1].mxu0 }
 0x11d   :  { %189 = vst [vmem:[#allocation7 + $0x8] sm:$0xff] %v181_v19  ;;  %v183_v20 = vpop.f32.mrb[2].mxu0 }
 0x11e   :  { %190 = vst [vmem:[#allocation7 + $0x10] sm:$0xff] %v183_v20  ;;  %v185_v21 = vpop.f32.mrb[3].mxu0 }
 0x11f   :  { %191 = vst [vmem:[#allocation7 + $0x18] sm:$0xff] %v185_v21 }
 0x120   :  { %317 = shalt.err (!%p314_p6)
}
 0x121   :  { %s318_s12 = scalar_lea.hbm %s397_s2, 512 }
 0x122   :  { %p319_p7 = scmp.ne.s32.totalorder %s397_s2, %s318_s12  ;;  %p322_p8 = scmp.lt.u32.totalorder %s318_s12, %s397_s2 }
 0x124   :  { %p324_p9 = pnand %p322_p8, %p319_p7 }
 0x126   :  { %327 = shalt.err (!%p324_p9)
}
 0x127   :  { %s342_s17 = smov 256   ;;  %s343_s18 = smov 16  }
 0x128   :  { %203 = dma.vmem_to_hbm [thread:$0]  %s198_s8, 512, %s397_s2, [#allocation4], %s342_s17, %s342_s17, %s343_s18  }
 0x129   :  { %332 = dma.done.wait [#allocation4], 512  }
 0x12a   :  { %333 = vsyncadd [#allocation4], 4294966784 }
 0x12b   :  { %207 = vsyncpa [#allocation3], 1 }
 0x12c   :  { %208 = vsyncpa [#allocation6], 1 }
 0x12d   :  { %209 = vsyncpa [#allocation4], 1 }

</bundles_post_ra>
